<compile_context>
chip_gen: v5e
topology: v5e:2x2
jax: 0.10.0
libtpu: 0.0.40
codegen_flags: <defaults>
</compile_context>

<pallas_src>
import functools

import jax
import jax.numpy as jnp
from jax.experimental import pallas as pl
from jax.experimental.pallas import tpu as pltpu


def _gru_discriminator_kernel(x_ref, wih_ref, whh_ref, bin_ref, bhhn_ref,
                              wlin_ref, blin_ref, out_ref):
    """GRU recurrence + Linear + Sigmoid, all in VMEM / vregs.

    x_ref:    (T, B, 1)   time-major scalar inputs (B already padded to sublanes)
    wih_ref:  (1, 3H)     input->hidden weights, gate columns packed r|z|n
    whh_ref:  (H, 3H)     hidden->hidden weights, packed so h @ whh = [gh_r|gh_z|gh_n]
    bin_ref:  (1, 3H)     [b_ih_r + b_hh_r | b_ih_z + b_hh_z | b_ih_n]
    bhhn_ref: (1, H)      b_hh_n (must stay separate: scaled by the reset gate)
    wlin_ref: (1, H)      final linear weight row
    blin_ref: (1, 1)      final linear bias
    out_ref:  (B, 1)      sigmoid(logit)
    """
    T, B, _ = x_ref.shape
    H = whh_ref.shape[0]

    # ---- hoisted off the serial critical path: all input-side gate math -------
    # gi_all[t] = x_t * W_ih + (b_ih [+ b_hh for r,z])      -> (T, B, 3H)
    x = x_ref[...]                                     # (T, B, 1)
    gi_all = x * wih_ref[...] + bin_ref[...]           # broadcast -> (T, B, 3H)

    whh = whh_ref[...]                                 # (H, 3H)
    bhh_n = bhhn_ref[...]                              # (1, H)

    # ---- fully unrolled recurrence, hidden state register-resident ------------
    h = jnp.zeros((B, H), jnp.float32)
    for t in range(T):                                 # T is static & small -> unroll
        gi = gi_all[t]                                 # (B, 3H), static slice
        # single fused MXU call for all three gates
        gh = jnp.dot(h, whh, preferred_element_type=jnp.float32)   # (B, 3H)
        r = jax.nn.sigmoid(gi[:, 0:H] + gh[:, 0:H])
        z = jax.nn.sigmoid(gi[:, H:2 * H] + gh[:, H:2 * H])
        n = jnp.tanh(gi[:, 2 * H:3 * H] + r * (gh[:, 2 * H:3 * H] + bhh_n))
        h = (1.0 - z) * n + z * h

    # ---- Linear(H, 1) + Sigmoid: broadcast-mul + lane reduce (no extra MXU) ---
    logit = jnp.sum(h * wlin_ref[...], axis=-1, keepdims=True) + blin_ref[...]
    out_ref[...] = jax.nn.sigmoid(logit).astype(out_ref.dtype)


def init_discriminator_params(key, hidden_dim):
    """Deterministic init with PyTorch-style uniform(-1/sqrt(H), 1/sqrt(H))."""
    H = hidden_dim
    bound = 1.0 / float(jnp.sqrt(jnp.float32(H)))
    ks = jax.random.split(key, 6)
    u = lambda k, shape: jax.random.uniform(k, shape, jnp.float32, -bound, bound)
    return {
        # PyTorch GRU parameter layout: (3H, in) / (3H, H) / (3H,), gate order r, z, n.
        "weight_ih_l0": u(ks[0], (3 * H, 1)),
        "weight_hh_l0": u(ks[1], (3 * H, H)),
        "bias_ih_l0": u(ks[2], (3 * H,)),
        "bias_hh_l0": u(ks[3], (3 * H,)),
        # nn.Linear(H, 1)
        "linear_weight": u(ks[4], (1, H)),
        "linear_bias": u(ks[5], (1,)),
    }


@functools.partial(jax.jit, static_argnames=("seq_len", "hidden_dim"))
def discriminator_forward(prediction, x_batch, params, *, seq_len, hidden_dim):
    """Forward pass matching the PyTorch module semantics.

    prediction: (B,) or (B, 1)
    x_batch:    (B, seq_len, F)  -> only feature 0 is used
    returns:    (B, 1) in [0, 1]
    """
    H = hidden_dim
    B = x_batch.shape[0]
    T = seq_len + 1

    # Glue (plain JAX): slice, concat, reshape, transpose to time-major.
    xb = x_batch[:, :, 0].astype(jnp.float32)                       # (B, seq_len)
    pred = prediction.reshape(-1, 1).astype(jnp.float32)            # (B, 1)
    d_input = jnp.concatenate([xb, pred], axis=1)                   # (B, T)
    d_input = d_input.reshape(B, T, 1).transpose(1, 0, 2)           # (T, B, 1)

    # Pad batch up to a sublane multiple (8): vreg-granular work is identical,
    # so the padding is free and the layout stays dense.
    B_pad = max(8, ((B + 7) // 8) * 8)
    if B_pad != B:
        d_input = jnp.pad(d_input, ((0, 0), (0, B_pad - B), (0, 0)))

    # Parameter repacking (once, outside the kernel, in XLA).
    w_ih = params["weight_ih_l0"]            # (3H, 1)
    w_hh = params["weight_hh_l0"]            # (3H, H)
    b_ih = params["bias_ih_l0"]              # (3H,)
    b_hh = params["bias_hh_l0"]              # (3H,)

    wih_row = w_ih.T                                              # (1, 3H), r|z|n
    whh_packed = w_hh.T                                           # (H, 3H), h @ W -> r|z|n
    bias_in = jnp.concatenate([b_ih[0:H] + b_hh[0:H],             # r biases pre-summed
                               b_ih[H:2 * H] + b_hh[H:2 * H],     # z biases pre-summed
                               b_ih[2 * H:3 * H]]).reshape(1, 3 * H)
    bhh_n = b_hh[2 * H:3 * H].reshape(1, H)                       # stays separate (scaled by r)
    wlin_row = params["linear_weight"].reshape(1, H)
    blin = params["linear_bias"].reshape(1, 1)

    vmem = pl.BlockSpec(memory_space=pltpu.MemorySpace.VMEM)
    out = pl.pallas_call(
        _gru_discriminator_kernel,
        out_shape=jax.ShapeDtypeStruct((B_pad, 1), jnp.float32),
        in_specs=[vmem] * 7,
        out_specs=vmem,
    )(d_input, wih_row, whh_packed, bias_in, bhh_n, wlin_row, blin)
    return out[:B]


def _reference_forward(prediction, x_batch, params, *, seq_len, hidden_dim):
    """Pure-JAX reference (mirrors torch.nn.GRU + Linear + Sigmoid)."""
    H = hidden_dim
    B = x_batch.shape[0]
    T = seq_len + 1
    xb = x_batch[:, :, 0].astype(jnp.float32)
    d_input = jnp.concatenate([xb, prediction.reshape(-1, 1)], axis=1)   # (B, T)
    x_tm = d_input.reshape(B, T, 1).transpose(1, 0, 2)                   # (T, B, 1)

    w_ih = params["weight_ih_l0"]          # (3H, 1)
    w_hh = params["weight_hh_l0"]          # (3H, H)
    b_ih = params["bias_ih_l0"]
    b_hh = params["bias_hh_l0"]

    def cell(h, x_t):
        gi = x_t @ w_ih.T + b_ih           # (B, 3H)
        gh = h @ w_hh.T + b_hh             # (B, 3H)
        i_r, i_z, i_n = jnp.split(gi, 3, axis=1)
        h_r, h_z, h_n = jnp.split(gh, 3, axis=1)
        r = jax.nn.sigmoid(i_r + h_r)
        z = jax.nn.sigmoid(i_z + h_z)
        n = jnp.tanh(i_n + r * h_n)
        h_new = (1.0 - z) * n + z * h
        return h_new, None

    h0 = jnp.zeros((B, H), jnp.float32)
    h_last, _ = jax.lax.scan(cell, h0, x_tm)
    logit = h_last @ params["linear_weight"].T + params["linear_bias"]
    return jax.nn.sigmoid(logit)


if __name__ == "__main__":
    seq_len = 8
    hidden_dim = 32
    batch = 2

    key = jax.random.PRNGKey(0)
    k_params, k_x, k_pred = jax.random.split(key, 3)

    params = init_discriminator_params(k_params, hidden_dim)
    x_batch = jax.random.normal(k_x, (batch, seq_len, 1), jnp.float32)
    prediction = jax.random.normal(k_pred, (batch,), jnp.float32)

    out = discriminator_forward(prediction, x_batch, params,
                                seq_len=seq_len, hidden_dim=hidden_dim)
    out = jax.block_until_ready(out)

    ref = _reference_forward(prediction, x_batch, params,
                             seq_len=seq_len, hidden_dim=hidden_dim)
    assert out.shape == (batch, 1)
    assert jnp.allclose(out, ref, atol=1e-5, rtol=1e-5), (out, ref)

    print("KERNEL_OK")
</pallas_src>

<mosaic_0001>
module attributes {stable_mosaic.version = 11 : i64} {
  func.func @_gru_discriminator_kernel(%arg0: memref<9x8x1xf32, #tpu.memory_space<vmem>>, %arg1: memref<1x96xf32, #tpu.memory_space<vmem>>, %arg2: memref<32x96xf32, #tpu.memory_space<vmem>>, %arg3: memref<1x96xf32, #tpu.memory_space<vmem>>, %arg4: memref<1x32xf32, #tpu.memory_space<vmem>>, %arg5: memref<1x32xf32, #tpu.memory_space<vmem>>, %arg6: memref<1x1xf32, #tpu.memory_space<vmem>>, %arg7: memref<8x1xf32, #tpu.memory_space<vmem>>) attributes {dimension_semantics = [], scalar_prefetch = 0 : i64, scratch_operands = 0 : i64, tpu.core_type = #tpu.core_type<tc>} {
    %c0 = arith.constant 0 : index
    %c0_0 = arith.constant 0 : index
    %c0_1 = arith.constant 0 : index
    %0 = vector.load %arg0[%c0, %c0_0, %c0_1] : memref<9x8x1xf32, #tpu.memory_space<vmem>>, vector<9x8x1xf32>
    %c0_2 = arith.constant 0 : index
    %c0_3 = arith.constant 0 : index
    %1 = vector.load %arg1[%c0_2, %c0_3] : memref<1x96xf32, #tpu.memory_space<vmem>>, vector<1x96xf32>
    %2 = vector.shape_cast %1 : vector<1x96xf32> to vector<1x1x96xf32>
    %3 = vector.broadcast %0 : vector<9x8x1xf32> to vector<9x8x96xf32>
    %4 = vector.broadcast %2 : vector<1x1x96xf32> to vector<9x8x96xf32>
    %5 = arith.mulf %3, %4 : vector<9x8x96xf32>
    %c0_4 = arith.constant 0 : index
    %c0_5 = arith.constant 0 : index
    %6 = vector.load %arg3[%c0_4, %c0_5] : memref<1x96xf32, #tpu.memory_space<vmem>>, vector<1x96xf32>
    %7 = vector.shape_cast %6 : vector<1x96xf32> to vector<1x1x96xf32>
    %8 = vector.broadcast %7 : vector<1x1x96xf32> to vector<9x8x96xf32>
    %9 = arith.addf %5, %8 : vector<9x8x96xf32>
    %c0_6 = arith.constant 0 : index
    %c0_7 = arith.constant 0 : index
    %10 = vector.load %arg2[%c0_6, %c0_7] : memref<32x96xf32, #tpu.memory_space<vmem>>, vector<32x96xf32>
    %c0_8 = arith.constant 0 : index
    %c0_9 = arith.constant 0 : index
    %11 = vector.load %arg4[%c0_8, %c0_9] : memref<1x32xf32, #tpu.memory_space<vmem>>, vector<1x32xf32>
    %cst = arith.constant 0.000000e+00 : f32
    %12 = vector.broadcast %cst : f32 to vector<8x32xf32>
    %13 = vector.extract_strided_slice %9 {offsets = [0, 0, 0], sizes = [1, 8, 96], strides = [1, 1, 1]} : vector<9x8x96xf32> to vector<1x8x96xf32>
    %14 = vector.shape_cast %13 : vector<1x8x96xf32> to vector<8x96xf32>
    %cst_10 = arith.constant dense<0.000000e+00> : vector<8x96xf32>
    %15 = tpu.matmul %12, %10, %cst_10 {dimension_numbers = #tpu.dot_dimension_numbers<[1], [0], [0], [1], [0, 0, 1, 1], [], []>} : vector<8x32xf32>, vector<32x96xf32>, vector<8x96xf32> -> vector<8x96xf32>
    %16 = vector.extract_strided_slice %14 {offsets = [0, 0], sizes = [8, 32], strides = [1, 1]} : vector<8x96xf32> to vector<8x32xf32>
    %17 = vector.extract_strided_slice %15 {offsets = [0, 0], sizes = [8, 32], strides = [1, 1]} : vector<8x96xf32> to vector<8x32xf32>
    %18 = arith.addf %16, %17 : vector<8x32xf32>
    %19 = arith.negf %18 : vector<8x32xf32>
    %20 = math.exp %19 : vector<8x32xf32>
    %cst_11 = arith.constant 1.000000e+00 : f32
    %21 = vector.broadcast %cst_11 : f32 to vector<8x32xf32>
    %22 = arith.addf %21, %20 : vector<8x32xf32>
    %23 = arith.divf %21, %22 : vector<8x32xf32>
    %24 = vector.extract_strided_slice %14 {offsets = [0, 32], sizes = [8, 32], strides = [1, 1]} : vector<8x96xf32> to vector<8x32xf32>
    %25 = vector.extract_strided_slice %15 {offsets = [0, 32], sizes = [8, 32], strides = [1, 1]} : vector<8x96xf32> to vector<8x32xf32>
    %26 = arith.addf %24, %25 : vector<8x32xf32>
    %27 = arith.negf %26 : vector<8x32xf32>
    %28 = math.exp %27 : vector<8x32xf32>
    %cst_12 = arith.constant 1.000000e+00 : f32
    %29 = vector.broadcast %cst_12 : f32 to vector<8x32xf32>
    %30 = arith.addf %29, %28 : vector<8x32xf32>
    %31 = arith.divf %29, %30 : vector<8x32xf32>
    %32 = vector.extract_strided_slice %14 {offsets = [0, 64], sizes = [8, 32], strides = [1, 1]} : vector<8x96xf32> to vector<8x32xf32>
    %33 = vector.extract_strided_slice %15 {offsets = [0, 64], sizes = [8, 32], strides = [1, 1]} : vector<8x96xf32> to vector<8x32xf32>
    %34 = vector.broadcast %11 : vector<1x32xf32> to vector<8x32xf32>
    %35 = arith.addf %33, %34 : vector<8x32xf32>
    %36 = arith.mulf %23, %35 : vector<8x32xf32>
    %37 = arith.addf %32, %36 : vector<8x32xf32>
    %38 = math.tanh %37 : vector<8x32xf32>
    %cst_13 = arith.constant 1.000000e+00 : f32
    %39 = vector.broadcast %cst_13 : f32 to vector<8x32xf32>
    %40 = arith.subf %39, %31 : vector<8x32xf32>
    %41 = arith.mulf %40, %38 : vector<8x32xf32>
    %42 = arith.mulf %31, %12 : vector<8x32xf32>
    %43 = arith.addf %41, %42 : vector<8x32xf32>
    %44 = vector.extract_strided_slice %9 {offsets = [1, 0, 0], sizes = [1, 8, 96], strides = [1, 1, 1]} : vector<9x8x96xf32> to vector<1x8x96xf32>
    %45 = vector.shape_cast %44 : vector<1x8x96xf32> to vector<8x96xf32>
    %cst_14 = arith.constant dense<0.000000e+00> : vector<8x96xf32>
    %46 = tpu.matmul %43, %10, %cst_14 {dimension_numbers = #tpu.dot_dimension_numbers<[1], [0], [0], [1], [0, 0, 1, 1], [], []>} : vector<8x32xf32>, vector<32x96xf32>, vector<8x96xf32> -> vector<8x96xf32>
    %47 = vector.extract_strided_slice %45 {offsets = [0, 0], sizes = [8, 32], strides = [1, 1]} : vector<8x96xf32> to vector<8x32xf32>
    %48 = vector.extract_strided_slice %46 {offsets = [0, 0], sizes = [8, 32], strides = [1, 1]} : vector<8x96xf32> to vector<8x32xf32>
    %49 = arith.addf %47, %48 : vector<8x32xf32>
    %50 = arith.negf %49 : vector<8x32xf32>
    %51 = math.exp %50 : vector<8x32xf32>
    %cst_15 = arith.constant 1.000000e+00 : f32
    %52 = vector.broadcast %cst_15 : f32 to vector<8x32xf32>
    %53 = arith.addf %52, %51 : vector<8x32xf32>
    %54 = arith.divf %52, %53 : vector<8x32xf32>
    %55 = vector.extract_strided_slice %45 {offsets = [0, 32], sizes = [8, 32], strides = [1, 1]} : vector<8x96xf32> to vector<8x32xf32>
    %56 = vector.extract_strided_slice %46 {offsets = [0, 32], sizes = [8, 32], strides = [1, 1]} : vector<8x96xf32> to vector<8x32xf32>
    %57 = arith.addf %55, %56 : vector<8x32xf32>
    %58 = arith.negf %57 : vector<8x32xf32>
    %59 = math.exp %58 : vector<8x32xf32>
    %cst_16 = arith.constant 1.000000e+00 : f32
    %60 = vector.broadcast %cst_16 : f32 to vector<8x32xf32>
    %61 = arith.addf %60, %59 : vector<8x32xf32>
    %62 = arith.divf %60, %61 : vector<8x32xf32>
    %63 = vector.extract_strided_slice %45 {offsets = [0, 64], sizes = [8, 32], strides = [1, 1]} : vector<8x96xf32> to vector<8x32xf32>
    %64 = vector.extract_strided_slice %46 {offsets = [0, 64], sizes = [8, 32], strides = [1, 1]} : vector<8x96xf32> to vector<8x32xf32>
    %65 = vector.broadcast %11 : vector<1x32xf32> to vector<8x32xf32>
    %66 = arith.addf %64, %65 : vector<8x32xf32>
    %67 = arith.mulf %54, %66 : vector<8x32xf32>
    %68 = arith.addf %63, %67 : vector<8x32xf32>
    %69 = math.tanh %68 : vector<8x32xf32>
    %cst_17 = arith.constant 1.000000e+00 : f32
    %70 = vector.broadcast %cst_17 : f32 to vector<8x32xf32>
    %71 = arith.subf %70, %62 : vector<8x32xf32>
    %72 = arith.mulf %71, %69 : vector<8x32xf32>
    %73 = arith.mulf %62, %43 : vector<8x32xf32>
    %74 = arith.addf %72, %73 : vector<8x32xf32>
    %75 = vector.extract_strided_slice %9 {offsets = [2, 0, 0], sizes = [1, 8, 96], strides = [1, 1, 1]} : vector<9x8x96xf32> to vector<1x8x96xf32>
    %76 = vector.shape_cast %75 : vector<1x8x96xf32> to vector<8x96xf32>
    %cst_18 = arith.constant dense<0.000000e+00> : vector<8x96xf32>
    %77 = tpu.matmul %74, %10, %cst_18 {dimension_numbers = #tpu.dot_dimension_numbers<[1], [0], [0], [1], [0, 0, 1, 1], [], []>} : vector<8x32xf32>, vector<32x96xf32>, vector<8x96xf32> -> vector<8x96xf32>
    %78 = vector.extract_strided_slice %76 {offsets = [0, 0], sizes = [8, 32], strides = [1, 1]} : vector<8x96xf32> to vector<8x32xf32>
    %79 = vector.extract_strided_slice %77 {offsets = [0, 0], sizes = [8, 32], strides = [1, 1]} : vector<8x96xf32> to vector<8x32xf32>
    %80 = arith.addf %78, %79 : vector<8x32xf32>
    %81 = arith.negf %80 : vector<8x32xf32>
    %82 = math.exp %81 : vector<8x32xf32>
    %cst_19 = arith.constant 1.000000e+00 : f32
    %83 = vector.broadcast %cst_19 : f32 to vector<8x32xf32>
    %84 = arith.addf %83, %82 : vector<8x32xf32>
    %85 = arith.divf %83, %84 : vector<8x32xf32>
    %86 = vector.extract_strided_slice %76 {offsets = [0, 32], sizes = [8, 32], strides = [1, 1]} : vector<8x96xf32> to vector<8x32xf32>
    %87 = vector.extract_strided_slice %77 {offsets = [0, 32], sizes = [8, 32], strides = [1, 1]} : vector<8x96xf32> to vector<8x32xf32>
    %88 = arith.addf %86, %87 : vector<8x32xf32>
    %89 = arith.negf %88 : vector<8x32xf32>
    %90 = math.exp %89 : vector<8x32xf32>
    %cst_20 = arith.constant 1.000000e+00 : f32
    %91 = vector.broadcast %cst_20 : f32 to vector<8x32xf32>
    %92 = arith.addf %91, %90 : vector<8x32xf32>
    %93 = arith.divf %91, %92 : vector<8x32xf32>
    %94 = vector.extract_strided_slice %76 {offsets = [0, 64], sizes = [8, 32], strides = [1, 1]} : vector<8x96xf32> to vector<8x32xf32>
    %95 = vector.extract_strided_slice %77 {offsets = [0, 64], sizes = [8, 32], strides = [1, 1]} : vector<8x96xf32> to vector<8x32xf32>
    %96 = vector.broadcast %11 : vector<1x32xf32> to vector<8x32xf32>
    %97 = arith.addf %95, %96 : vector<8x32xf32>
    %98 = arith.mulf %85, %97 : vector<8x32xf32>
    %99 = arith.addf %94, %98 : vector<8x32xf32>
    %100 = math.tanh %99 : vector<8x32xf32>
    %cst_21 = arith.constant 1.000000e+00 : f32
    %101 = vector.broadcast %cst_21 : f32 to vector<8x32xf32>
    %102 = arith.subf %101, %93 : vector<8x32xf32>
    %103 = arith.mulf %102, %100 : vector<8x32xf32>
    %104 = arith.mulf %93, %74 : vector<8x32xf32>
    %105 = arith.addf %103, %104 : vector<8x32xf32>
    %106 = vector.extract_strided_slice %9 {offsets = [3, 0, 0], sizes = [1, 8, 96], strides = [1, 1, 1]} : vector<9x8x96xf32> to vector<1x8x96xf32>
    %107 = vector.shape_cast %106 : vector<1x8x96xf32> to vector<8x96xf32>
    %cst_22 = arith.constant dense<0.000000e+00> : vector<8x96xf32>
    %108 = tpu.matmul %105, %10, %cst_22 {dimension_numbers = #tpu.dot_dimension_numbers<[1], [0], [0], [1], [0, 0, 1, 1], [], []>} : vector<8x32xf32>, vector<32x96xf32>, vector<8x96xf32> -> vector<8x96xf32>
    %109 = vector.extract_strided_slice %107 {offsets = [0, 0], sizes = [8, 32], strides = [1, 1]} : vector<8x96xf32> to vector<8x32xf32>
    %110 = vector.extract_strided_slice %108 {offsets = [0, 0], sizes = [8, 32], strides = [1, 1]} : vector<8x96xf32> to vector<8x32xf32>
    %111 = arith.addf %109, %110 : vector<8x32xf32>
    %112 = arith.negf %111 : vector<8x32xf32>
    %113 = math.exp %112 : vector<8x32xf32>
    %cst_23 = arith.constant 1.000000e+00 : f32
    %114 = vector.broadcast %cst_23 : f32 to vector<8x32xf32>
    %115 = arith.addf %114, %113 : vector<8x32xf32>
    %116 = arith.divf %114, %115 : vector<8x32xf32>
    %117 = vector.extract_strided_slice %107 {offsets = [0, 32], sizes = [8, 32], strides = [1, 1]} : vector<8x96xf32> to vector<8x32xf32>
    %118 = vector.extract_strided_slice %108 {offsets = [0, 32], sizes = [8, 32], strides = [1, 1]} : vector<8x96xf32> to vector<8x32xf32>
    %119 = arith.addf %117, %118 : vector<8x32xf32>
    %120 = arith.negf %119 : vector<8x32xf32>
    %121 = math.exp %120 : vector<8x32xf32>
    %cst_24 = arith.constant 1.000000e+00 : f32
    %122 = vector.broadcast %cst_24 : f32 to vector<8x32xf32>
    %123 = arith.addf %122, %121 : vector<8x32xf32>
    %124 = arith.divf %122, %123 : vector<8x32xf32>
    %125 = vector.extract_strided_slice %107 {offsets = [0, 64], sizes = [8, 32], strides = [1, 1]} : vector<8x96xf32> to vector<8x32xf32>
    %126 = vector.extract_strided_slice %108 {offsets = [0, 64], sizes = [8, 32], strides = [1, 1]} : vector<8x96xf32> to vector<8x32xf32>
    %127 = vector.broadcast %11 : vector<1x32xf32> to vector<8x32xf32>
    %128 = arith.addf %126, %127 : vector<8x32xf32>
    %129 = arith.mulf %116, %128 : vector<8x32xf32>
    %130 = arith.addf %125, %129 : vector<8x32xf32>
    %131 = math.tanh %130 : vector<8x32xf32>
    %cst_25 = arith.constant 1.000000e+00 : f32
    %132 = vector.broadcast %cst_25 : f32 to vector<8x32xf32>
    %133 = arith.subf %132, %124 : vector<8x32xf32>
    %134 = arith.mulf %133, %131 : vector<8x32xf32>
    %135 = arith.mulf %124, %105 : vector<8x32xf32>
    %136 = arith.addf %134, %135 : vector<8x32xf32>
    %137 = vector.extract_strided_slice %9 {offsets = [4, 0, 0], sizes = [1, 8, 96], strides = [1, 1, 1]} : vector<9x8x96xf32> to vector<1x8x96xf32>
    %138 = vector.shape_cast %137 : vector<1x8x96xf32> to vector<8x96xf32>
    %cst_26 = arith.constant dense<0.000000e+00> : vector<8x96xf32>
    %139 = tpu.matmul %136, %10, %cst_26 {dimension_numbers = #tpu.dot_dimension_numbers<[1], [0], [0], [1], [0, 0, 1, 1], [], []>} : vector<8x32xf32>, vector<32x96xf32>, vector<8x96xf32> -> vector<8x96xf32>
    %140 = vector.extract_strided_slice %138 {offsets = [0, 0], sizes = [8, 32], strides = [1, 1]} : vector<8x96xf32> to vector<8x32xf32>
    %141 = vector.extract_strided_slice %139 {offsets = [0, 0], sizes = [8, 32], strides = [1, 1]} : vector<8x96xf32> to vector<8x32xf32>
    %142 = arith.addf %140, %141 : vector<8x32xf32>
    %143 = arith.negf %142 : vector<8x32xf32>
    %144 = math.exp %143 : vector<8x32xf32>
    %cst_27 = arith.constant 1.000000e+00 : f32
    %145 = vector.broadcast %cst_27 : f32 to vector<8x32xf32>
    %146 = arith.addf %145, %144 : vector<8x32xf32>
    %147 = arith.divf %145, %146 : vector<8x32xf32>
    %148 = vector.extract_strided_slice %138 {offsets = [0, 32], sizes = [8, 32], strides = [1, 1]} : vector<8x96xf32> to vector<8x32xf32>
    %149 = vector.extract_strided_slice %139 {offsets = [0, 32], sizes = [8, 32], strides = [1, 1]} : vector<8x96xf32> to vector<8x32xf32>
    %150 = arith.addf %148, %149 : vector<8x32xf32>
    %151 = arith.negf %150 : vector<8x32xf32>
    %152 = math.exp %151 : vector<8x32xf32>
    %cst_28 = arith.constant 1.000000e+00 : f32
    %153 = vector.broadcast %cst_28 : f32 to vector<8x32xf32>
    %154 = arith.addf %153, %152 : vector<8x32xf32>
    %155 = arith.divf %153, %154 : vector<8x32xf32>
    %156 = vector.extract_strided_slice %138 {offsets = [0, 64], sizes = [8, 32], strides = [1, 1]} : vector<8x96xf32> to vector<8x32xf32>
    %157 = vector.extract_strided_slice %139 {offsets = [0, 64], sizes = [8, 32], strides = [1, 1]} : vector<8x96xf32> to vector<8x32xf32>
    %158 = vector.broadcast %11 : vector<1x32xf32> to vector<8x32xf32>
    %159 = arith.addf %157, %158 : vector<8x32xf32>
    %160 = arith.mulf %147, %159 : vector<8x32xf32>
    %161 = arith.addf %156, %160 : vector<8x32xf32>
    %162 = math.tanh %161 : vector<8x32xf32>
    %cst_29 = arith.constant 1.000000e+00 : f32
    %163 = vector.broadcast %cst_29 : f32 to vector<8x32xf32>
    %164 = arith.subf %163, %155 : vector<8x32xf32>
    %165 = arith.mulf %164, %162 : vector<8x32xf32>
    %166 = arith.mulf %155, %136 : vector<8x32xf32>
    %167 = arith.addf %165, %166 : vector<8x32xf32>
    %168 = vector.extract_strided_slice %9 {offsets = [5, 0, 0], sizes = [1, 8, 96], strides = [1, 1, 1]} : vector<9x8x96xf32> to vector<1x8x96xf32>
    %169 = vector.shape_cast %168 : vector<1x8x96xf32> to vector<8x96xf32>
    %cst_30 = arith.constant dense<0.000000e+00> : vector<8x96xf32>
    %170 = tpu.matmul %167, %10, %cst_30 {dimension_numbers = #tpu.dot_dimension_numbers<[1], [0], [0], [1], [0, 0, 1, 1], [], []>} : vector<8x32xf32>, vector<32x96xf32>, vector<8x96xf32> -> vector<8x96xf32>
    %171 = vector.extract_strided_slice %169 {offsets = [0, 0], sizes = [8, 32], strides = [1, 1]} : vector<8x96xf32> to vector<8x32xf32>
    %172 = vector.extract_strided_slice %170 {offsets = [0, 0], sizes = [8, 32], strides = [1, 1]} : vector<8x96xf32> to vector<8x32xf32>
    %173 = arith.addf %171, %172 : vector<8x32xf32>
    %174 = arith.negf %173 : vector<8x32xf32>
    %175 = math.exp %174 : vector<8x32xf32>
    %cst_31 = arith.constant 1.000000e+00 : f32
    %176 = vector.broadcast %cst_31 : f32 to vector<8x32xf32>
    %177 = arith.addf %176, %175 : vector<8x32xf32>
    %178 = arith.divf %176, %177 : vector<8x32xf32>
    %179 = vector.extract_strided_slice %169 {offsets = [0, 32], sizes = [8, 32], strides = [1, 1]} : vector<8x96xf32> to vector<8x32xf32>
    %180 = vector.extract_strided_slice %170 {offsets = [0, 32], sizes = [8, 32], strides = [1, 1]} : vector<8x96xf32> to vector<8x32xf32>
    %181 = arith.addf %179, %180 : vector<8x32xf32>
    %182 = arith.negf %181 : vector<8x32xf32>
    %183 = math.exp %182 : vector<8x32xf32>
    %cst_32 = arith.constant 1.000000e+00 : f32
    %184 = vector.broadcast %cst_32 : f32 to vector<8x32xf32>
    %185 = arith.addf %184, %183 : vector<8x32xf32>
    %186 = arith.divf %184, %185 : vector<8x32xf32>
    %187 = vector.extract_strided_slice %169 {offsets = [0, 64], sizes = [8, 32], strides = [1, 1]} : vector<8x96xf32> to vector<8x32xf32>
    %188 = vector.extract_strided_slice %170 {offsets = [0, 64], sizes = [8, 32], strides = [1, 1]} : vector<8x96xf32> to vector<8x32xf32>
    %189 = vector.broadcast %11 : vector<1x32xf32> to vector<8x32xf32>
    %190 = arith.addf %188, %189 : vector<8x32xf32>
    %191 = arith.mulf %178, %190 : vector<8x32xf32>
    %192 = arith.addf %187, %191 : vector<8x32xf32>
    %193 = math.tanh %192 : vector<8x32xf32>
    %cst_33 = arith.constant 1.000000e+00 : f32
    %194 = vector.broadcast %cst_33 : f32 to vector<8x32xf32>
    %195 = arith.subf %194, %186 : vector<8x32xf32>
    %196 = arith.mulf %195, %193 : vector<8x32xf32>
    %197 = arith.mulf %186, %167 : vector<8x32xf32>
    %198 = arith.addf %196, %197 : vector<8x32xf32>
    %199 = vector.extract_strided_slice %9 {offsets = [6, 0, 0], sizes = [1, 8, 96], strides = [1, 1, 1]} : vector<9x8x96xf32> to vector<1x8x96xf32>
    %200 = vector.shape_cast %199 : vector<1x8x96xf32> to vector<8x96xf32>
    %cst_34 = arith.constant dense<0.000000e+00> : vector<8x96xf32>
    %201 = tpu.matmul %198, %10, %cst_34 {dimension_numbers = #tpu.dot_dimension_numbers<[1], [0], [0], [1], [0, 0, 1, 1], [], []>} : vector<8x32xf32>, vector<32x96xf32>, vector<8x96xf32> -> vector<8x96xf32>
    %202 = vector.extract_strided_slice %200 {offsets = [0, 0], sizes = [8, 32], strides = [1, 1]} : vector<8x96xf32> to vector<8x32xf32>
    %203 = vector.extract_strided_slice %201 {offsets = [0, 0], sizes = [8, 32], strides = [1, 1]} : vector<8x96xf32> to vector<8x32xf32>
    %204 = arith.addf %202, %203 : vector<8x32xf32>
    %205 = arith.negf %204 : vector<8x32xf32>
    %206 = math.exp %205 : vector<8x32xf32>
    %cst_35 = arith.constant 1.000000e+00 : f32
    %207 = vector.broadcast %cst_35 : f32 to vector<8x32xf32>
    %208 = arith.addf %207, %206 : vector<8x32xf32>
    %209 = arith.divf %207, %208 : vector<8x32xf32>
    %210 = vector.extract_strided_slice %200 {offsets = [0, 32], sizes = [8, 32], strides = [1, 1]} : vector<8x96xf32> to vector<8x32xf32>
    %211 = vector.extract_strided_slice %201 {offsets = [0, 32], sizes = [8, 32], strides = [1, 1]} : vector<8x96xf32> to vector<8x32xf32>
    %212 = arith.addf %210, %211 : vector<8x32xf32>
    %213 = arith.negf %212 : vector<8x32xf32>
    %214 = math.exp %213 : vector<8x32xf32>
    %cst_36 = arith.constant 1.000000e+00 : f32
    %215 = vector.broadcast %cst_36 : f32 to vector<8x32xf32>
    %216 = arith.addf %215, %214 : vector<8x32xf32>
    %217 = arith.divf %215, %216 : vector<8x32xf32>
    %218 = vector.extract_strided_slice %200 {offsets = [0, 64], sizes = [8, 32], strides = [1, 1]} : vector<8x96xf32> to vector<8x32xf32>
    %219 = vector.extract_strided_slice %201 {offsets = [0, 64], sizes = [8, 32], strides = [1, 1]} : vector<8x96xf32> to vector<8x32xf32>
    %220 = vector.broadcast %11 : vector<1x32xf32> to vector<8x32xf32>
    %221 = arith.addf %219, %220 : vector<8x32xf32>
    %222 = arith.mulf %209, %221 : vector<8x32xf32>
    %223 = arith.addf %218, %222 : vector<8x32xf32>
    %224 = math.tanh %223 : vector<8x32xf32>
    %cst_37 = arith.constant 1.000000e+00 : f32
    %225 = vector.broadcast %cst_37 : f32 to vector<8x32xf32>
    %226 = arith.subf %225, %217 : vector<8x32xf32>
    %227 = arith.mulf %226, %224 : vector<8x32xf32>
    %228 = arith.mulf %217, %198 : vector<8x32xf32>
    %229 = arith.addf %227, %228 : vector<8x32xf32>
    %230 = vector.extract_strided_slice %9 {offsets = [7, 0, 0], sizes = [1, 8, 96], strides = [1, 1, 1]} : vector<9x8x96xf32> to vector<1x8x96xf32>
    %231 = vector.shape_cast %230 : vector<1x8x96xf32> to vector<8x96xf32>
    %cst_38 = arith.constant dense<0.000000e+00> : vector<8x96xf32>
    %232 = tpu.matmul %229, %10, %cst_38 {dimension_numbers = #tpu.dot_dimension_numbers<[1], [0], [0], [1], [0, 0, 1, 1], [], []>} : vector<8x32xf32>, vector<32x96xf32>, vector<8x96xf32> -> vector<8x96xf32>
    %233 = vector.extract_strided_slice %231 {offsets = [0, 0], sizes = [8, 32], strides = [1, 1]} : vector<8x96xf32> to vector<8x32xf32>
    %234 = vector.extract_strided_slice %232 {offsets = [0, 0], sizes = [8, 32], strides = [1, 1]} : vector<8x96xf32> to vector<8x32xf32>
    %235 = arith.addf %233, %234 : vector<8x32xf32>
    %236 = arith.negf %235 : vector<8x32xf32>
    %237 = math.exp %236 : vector<8x32xf32>
    %cst_39 = arith.constant 1.000000e+00 : f32
    %238 = vector.broadcast %cst_39 : f32 to vector<8x32xf32>
    %239 = arith.addf %238, %237 : vector<8x32xf32>
    %240 = arith.divf %238, %239 : vector<8x32xf32>
    %241 = vector.extract_strided_slice %231 {offsets = [0, 32], sizes = [8, 32], strides = [1, 1]} : vector<8x96xf32> to vector<8x32xf32>
    %242 = vector.extract_strided_slice %232 {offsets = [0, 32], sizes = [8, 32], strides = [1, 1]} : vector<8x96xf32> to vector<8x32xf32>
    %243 = arith.addf %241, %242 : vector<8x32xf32>
    %244 = arith.negf %243 : vector<8x32xf32>
    %245 = math.exp %244 : vector<8x32xf32>
    %cst_40 = arith.constant 1.000000e+00 : f32
    %246 = vector.broadcast %cst_40 : f32 to vector<8x32xf32>
    %247 = arith.addf %246, %245 : vector<8x32xf32>
    %248 = arith.divf %246, %247 : vector<8x32xf32>
    %249 = vector.extract_strided_slice %231 {offsets = [0, 64], sizes = [8, 32], strides = [1, 1]} : vector<8x96xf32> to vector<8x32xf32>
    %250 = vector.extract_strided_slice %232 {offsets = [0, 64], sizes = [8, 32], strides = [1, 1]} : vector<8x96xf32> to vector<8x32xf32>
    %251 = vector.broadcast %11 : vector<1x32xf32> to vector<8x32xf32>
    %252 = arith.addf %250, %251 : vector<8x32xf32>
    %253 = arith.mulf %240, %252 : vector<8x32xf32>
    %254 = arith.addf %249, %253 : vector<8x32xf32>
    %255 = math.tanh %254 : vector<8x32xf32>
    %cst_41 = arith.constant 1.000000e+00 : f32
    %256 = vector.broadcast %cst_41 : f32 to vector<8x32xf32>
    %257 = arith.subf %256, %248 : vector<8x32xf32>
    %258 = arith.mulf %257, %255 : vector<8x32xf32>
    %259 = arith.mulf %248, %229 : vector<8x32xf32>
    %260 = arith.addf %258, %259 : vector<8x32xf32>
    %261 = vector.extract_strided_slice %9 {offsets = [8, 0, 0], sizes = [1, 8, 96], strides = [1, 1, 1]} : vector<9x8x96xf32> to vector<1x8x96xf32>
    %262 = vector.shape_cast %261 : vector<1x8x96xf32> to vector<8x96xf32>
    %cst_42 = arith.constant dense<0.000000e+00> : vector<8x96xf32>
    %263 = tpu.matmul %260, %10, %cst_42 {dimension_numbers = #tpu.dot_dimension_numbers<[1], [0], [0], [1], [0, 0, 1, 1], [], []>} : vector<8x32xf32>, vector<32x96xf32>, vector<8x96xf32> -> vector<8x96xf32>
    %264 = vector.extract_strided_slice %262 {offsets = [0, 0], sizes = [8, 32], strides = [1, 1]} : vector<8x96xf32> to vector<8x32xf32>
    %265 = vector.extract_strided_slice %263 {offsets = [0, 0], sizes = [8, 32], strides = [1, 1]} : vector<8x96xf32> to vector<8x32xf32>
    %266 = arith.addf %264, %265 : vector<8x32xf32>
    %267 = arith.negf %266 : vector<8x32xf32>
    %268 = math.exp %267 : vector<8x32xf32>
    %cst_43 = arith.constant 1.000000e+00 : f32
    %269 = vector.broadcast %cst_43 : f32 to vector<8x32xf32>
    %270 = arith.addf %269, %268 : vector<8x32xf32>
    %271 = arith.divf %269, %270 : vector<8x32xf32>
    %272 = vector.extract_strided_slice %262 {offsets = [0, 32], sizes = [8, 32], strides = [1, 1]} : vector<8x96xf32> to vector<8x32xf32>
    %273 = vector.extract_strided_slice %263 {offsets = [0, 32], sizes = [8, 32], strides = [1, 1]} : vector<8x96xf32> to vector<8x32xf32>
    %274 = arith.addf %272, %273 : vector<8x32xf32>
    %275 = arith.negf %274 : vector<8x32xf32>
    %276 = math.exp %275 : vector<8x32xf32>
    %cst_44 = arith.constant 1.000000e+00 : f32
    %277 = vector.broadcast %cst_44 : f32 to vector<8x32xf32>
    %278 = arith.addf %277, %276 : vector<8x32xf32>
    %279 = arith.divf %277, %278 : vector<8x32xf32>
    %280 = vector.extract_strided_slice %262 {offsets = [0, 64], sizes = [8, 32], strides = [1, 1]} : vector<8x96xf32> to vector<8x32xf32>
    %281 = vector.extract_strided_slice %263 {offsets = [0, 64], sizes = [8, 32], strides = [1, 1]} : vector<8x96xf32> to vector<8x32xf32>
    %282 = vector.broadcast %11 : vector<1x32xf32> to vector<8x32xf32>
    %283 = arith.addf %281, %282 : vector<8x32xf32>
    %284 = arith.mulf %271, %283 : vector<8x32xf32>
    %285 = arith.addf %280, %284 : vector<8x32xf32>
    %286 = math.tanh %285 : vector<8x32xf32>
    %cst_45 = arith.constant 1.000000e+00 : f32
    %287 = vector.broadcast %cst_45 : f32 to vector<8x32xf32>
    %288 = arith.subf %287, %279 : vector<8x32xf32>
    %289 = arith.mulf %288, %286 : vector<8x32xf32>
    %290 = arith.mulf %279, %260 : vector<8x32xf32>
    %291 = arith.addf %289, %290 : vector<8x32xf32>
    %c0_46 = arith.constant 0 : index
    %c0_47 = arith.constant 0 : index
    %292 = vector.load %arg5[%c0_46, %c0_47] : memref<1x32xf32, #tpu.memory_space<vmem>>, vector<1x32xf32>
    %293 = vector.broadcast %292 : vector<1x32xf32> to vector<8x32xf32>
    %294 = arith.mulf %291, %293 : vector<8x32xf32>
    %cst_48 = arith.constant dense<0.000000e+00> : vector<8xf32>
    %295 = vector.multi_reduction <add>, %294, %cst_48 [1] : vector<8x32xf32> to vector<8xf32>
    %296 = vector.shape_cast %295 : vector<8xf32> to vector<8x1xf32>
    %c0_49 = arith.constant 0 : index
    %c0_50 = arith.constant 0 : index
    %297 = vector.load %arg6[%c0_49, %c0_50] : memref<1x1xf32, #tpu.memory_space<vmem>>, vector<1x1xf32>
    %298 = vector.broadcast %297 : vector<1x1xf32> to vector<8x1xf32>
    %299 = arith.addf %296, %298 : vector<8x1xf32>
    %300 = arith.negf %299 : vector<8x1xf32>
    %301 = math.exp %300 : vector<8x1xf32>
    %cst_51 = arith.constant 1.000000e+00 : f32
    %302 = vector.broadcast %cst_51 : f32 to vector<8x1xf32>
    %303 = arith.addf %302, %301 : vector<8x1xf32>
    %304 = arith.divf %302, %303 : vector<8x1xf32>
    %c0_52 = arith.constant 0 : index
    %c0_53 = arith.constant 0 : index
    %305 = vector.load %arg7[%c0_52, %c0_53] : memref<8x1xf32, #tpu.memory_space<vmem>>, vector<8x1xf32>
    tpu.vector_store %arg7[%c0_52, %c0_53], %304 {strides = array<i32>} : memref<8x1xf32, #tpu.memory_space<vmem>>, vector<8x1xf32>,
    return
  }
}

</mosaic_0001>

<bundles_post_ra>
// kernel: discriminator_forward.1
= control target key start
LH: loop header
LB: loop body
LE: loop exit
PB: predicated region body
PF: predicated region fallthrough
CT: control target
= control target key end

     0   :  { %v835_v2 = vmov 0   ;;  %s836_s9 = smov 64   ;;  %v837_v6 = vmov 0.0   ;;  %vm113_vm4 = vcmask 261120   ;;  %s839_s10 = smov 32   ;;  %s1016_s2 = inlined_call_operand.vmem [shape: f32[32,96], index: 2, kind: input, shape index: {}]   ;;  %s1017_s4 = inlined_call_operand.vmem [shape: f32[1,32], index: 4, kind: input, shape index: {}]   ;;  %s1018_s1 = inlined_call_operand.vmem [shape: f32[1,96], index: 1, kind: input, shape index: {}]   ;;  %s1019_s3 = inlined_call_operand.vmem [shape: f32[1,96], index: 3, kind: input, shape index: {}]   ;;  %s1020_s0 = inlined_call_operand.vmem [shape: f32[9,8,1], index: 0, kind: input, shape index: {}]   ;;  %s1021_s5 = inlined_call_operand.vmem [shape: f32[1,32], index: 5, kind: input, shape index: {}]   ;;  %s1022_s6 = inlined_call_operand.<no memory space> [shape: f32[1,1], index: 6, kind: input, shape index: {}]   ;;  %s1023_s7 = inlined_call_operand.vmem [shape: f32[8,1], index: 7, kind: output, shape index: {}]  }
   0x1   :  { %v111_v0 = vld [vmem:[%s1016_s2 + $0x18] sm:$0xff]  ;;  %v110_v1 = vld [vmem:[%s1016_s2 + $0x10] sm:$0xff]  ;;  %769 = vset.pattern.permute.xlu0 %v835_v2  ;;  %770 = vset.pattern.permute.xlu1 %v835_v2  ;;  %v772_v3 = vld [vmem:[%s1017_s4] ss:$0 sm:$0xff] }
   0x2   :  { %129 = vmatpush.msra.mxu0 %v111_v0  ;;  %199 = vmatpush.msra.mxu1 %v111_v0  ;;  %v109_v4 = vld [vmem:[%s1016_s2 + $0x8] sm:$0xff]  ;;  %v108_v5 = vld [vmem:[%s1016_s2] sm:$0xff]  ;;  %v30_v63 = vld [vmem:[%s1020_s0 + $0x10] sm:$0xff] }
   0x3   :  { %264 = vmatpush.msra.mxu2 %v111_v0  ;;  %329 = vmatpush.msra.mxu3 %v111_v0  ;;  %v28_v7 = vld [vmem:[%s1020_s0] sm:$0xff]  ;;  %v29_v40 = vld [vmem:[%s1020_s0 + $0x8] sm:$0xff] }
   0x4   :  { %130 = vmatpush.msra.mxu0 %v110_v1  ;;  %159 = vrot.lane.b32.xlu0 %v772_v3, %s836_s9  ;;  %v906_v11 = vld [vmem:[%s1018_s1] ss:$0 sm:$0xff]  ;;  %s838_s1 = smov 96  }
   0x5   :  { %200 = vmatpush.msra.mxu1 %v110_v1  ;;  %265 = vmatpush.msra.mxu2 %v110_v1  ;;  %v911_v13 = vld [vmem:[%s1019_s3] ss:$0 sm:$0xff] }
   0x6   :  { %131 = vmatpush.msra.mxu0 %v109_v4  ;;  %330 = vmatpush.msra.mxu3 %v110_v1 }
   0x7   :  { %201 = vmatpush.msra.mxu1 %v109_v4  ;;  %266 = vmatpush.msra.mxu2 %v109_v4 }
   0x8   :  { %132 = vmatpush.msra.mxu0 %v108_v5  ;;  %331 = vmatpush.msra.mxu3 %v109_v4 }
   0x9   :  { %133 = vmatmul.f32.vlgmr.msra.gmra.mxu0 %v837_v6  ;;  %202 = vmatpush.msra.mxu1 %v108_v5 }
   0xa   :  { %267 = vmatpush.msra.mxu2 %v108_v5  ;;  %332 = vmatpush.msra.mxu3 %v108_v5 }
   0xb   :  { %771 = vset.pattern.permute.xlu2 %v835_v2  ;;  %394 = vmatpush.msrb.mxu0 %v111_v0 }
   0xc   :  { %40 = vperm.xlu0 %769, %v28_v7   ;;  %459 = vmatpush.msrb.mxu1 %v111_v0 }
   0xd   :  { %395 = vmatpush.msrb.mxu0 %v110_v1  ;;  %524 = vmatpush.msrb.mxu2 %v111_v0 }
   0xe   :  { %460 = vmatpush.msrb.mxu1 %v110_v1  ;;  %589 = vmatpush.msrb.mxu3 %v111_v0 }
   0xf   :  { %396 = vmatpush.msrb.mxu0 %v109_v4  ;;  %525 = vmatpush.msrb.mxu2 %v110_v1 }
  0x10   :  { %461 = vmatpush.msrb.mxu1 %v109_v4  ;;  %590 = vmatpush.msrb.mxu3 %v110_v1 }
  0x11   :  { %397 = vmatpush.msrb.mxu0 %v108_v5  ;;  %526 = vmatpush.msrb.mxu2 %v109_v4 }
  0x12   :  { %462 = vmatpush.msrb.mxu1 %v108_v5  ;;  %591 = vmatpush.msrb.mxu3 %v109_v4 }
  0x13   :  { %527 = vmatpush.msrb.mxu2 %v108_v5  ;;  %654 = vmatpush.msra.mxu0 %v111_v0 }
  0x14   :  { %592 = vmatpush.msrb.mxu3 %v108_v5 }
  0x15   :  { %655 = vmatpush.msra.mxu0 %v110_v1 }
  0x17   :  { %656 = vmatpush.msra.mxu0 %v109_v4 }
  0x19   :  { %657 = vmatpush.msra.mxu0 %v108_v5 }
  0x76   :  { %v899_v8 = vpop.permute.xlu0 %159 }
  0x7e   :  { %v41_v12 = vpop.permute.xlu0 %40 }
  0x7f   :  { %v86_v14 = vmul.f32 %v906_v11, %v41_v12 }
  0x81   :  { %v99_v15 = vadd.f32 %v911_v13, %v86_v14 }
  0x86   :  { %v134_v9 = vpop.f32.mrf.mxu0 }
  0x87   :  { %v162_v10 = vadd.f32 %v899_v8, %v134_v9  ;;  %v137_v16 = vadd.f32 %v134_v9, %v99_v15 }
  0x89   :  { %164 = vrot.lane.b32.xlu1 %v162_v10, %s836_s9  ;;  %v746_v17 = vmul.f32 -1.442695, %v137_v16 }
  0x8b   :  { %777 = vpow2.f32 %v746_v17 }
  0x91   :  { %v778_v18 = vpop.eup %777 }
  0x92   :  { %v141_v19 = vadd.f32 1.0, %v778_v18 }
  0x94   :  { %779 = vrcp.f32 %v141_v19  ;;  %v153_v25 = vand.u32 2147483648, %v141_v19  ;;  %vm147_vm1 = vweird.f32 %v141_v19  ;;  %v151_v26 = vand.u32 2147483647, %v141_v19 }
  0x96   :  { %v154_v28 = vor.u32 1.1754944e-38, %v153_v25  ;;  %vm152_vm3 = vcmp.eq.f32.partialorder %v151_v26, 8.507059e+37 }
  0x9a   :  { %v780_v20 = vpop.eup %779 }
  0x9b   :  { %v143_v21 = vmul.f32 %v780_v20, %v141_v19  ;;  %vm148_vm0 = vweird.f32 %v780_v20 }
  0x9c   :  { %vm149_vm2 = vmor %vm147_vm1, %vm148_vm0 }
  0x9d   :  { %v144_v22 = vsub.f32 1.0, %v143_v21 }
  0x9f   :  { %v145_v23 = vmul.f32 %v780_v20, %v144_v22 }
  0xa1   :  { %v146_v24 = vadd.f32 %v780_v20, %v145_v23 }
  0xa3   :  { %v150_v27 = vsel %vm149_vm2, %v780_v20, %v146_v24 }
  0xa4   :  { %v155_v30 = vsel %vm152_vm3, %v154_v28, %v150_v27 }
  0xa5   :  { %v174_v35 = vsub.f32 1.0, %v155_v30  ;;  %v180_v37 = vmul.f32 0.0, %v155_v30 }
  0xfb   :  { %v165_v29 = vpop.permute.xlu1 %164 }
  0xfc   :  { %v167_v31 = vmul.f32 %v165_v29, %v155_v30 }
  0xfe   :  { %169 = vrot.lane.b32.xlu1 %v167_v31, %s836_s9 }
 0x106   :  { %45 = vperm.xlu1 %770, %v29_v40  }
 0x170   :  { %v170_v32 = vpop.permute.xlu1 %169 }
 0x171   :  { %v172_v33 = vadd.f32 %v170_v32, %v99_v15 }
 0x173   :  { %781 = vtanh.f32 %v172_v33 }
 0x178   :  { %v46_v44 = vpop.permute.xlu1 %45 }
 0x179   :  { %v782_v34 = vpop.eup %781  ;;  %v87_v45 = vmul.f32 %v906_v11, %v46_v44 }
 0x17a   :  { %176 = vrot.lane.b32.xlu2 %v782_v34, %s838_s1 }
 0x17b   :  { %v100_v46 = vadd.f32 %v911_v13, %v87_v45 }
 0x1d4   :  { %v177_v36 = vpop.permute.xlu2 %176 }
 0x1d5   :  { %v179_v38 = vmul.f32 %v177_v36, %v174_v35 }
 0x1d7   :  { %v181_v39 = vadd.f32 %v180_v37, %v179_v38 }
 0x1d9   :  { %183 = vrot.lane.b32.xlu2 %v181_v39, %s838_s1 }
 0x233   :  { %v184_v41 = vpop.permute.xlu2 %183 }
 0x234   :  { %747 = vmatmul.msk.f32.vlgmr.msra.gmra.mxu1 %vm113_vm4, %v184_v41  ;;  %v31_v41 = vld [vmem:[%s1020_s0 + $0x18] sm:$0xff] }
 0x2b1   :  { %v204_v42 = vpop.f32.mrf.mxu1 }
 0x2b2   :  { %v227_v43 = vadd.f32 %v204_v42, %v899_v8  ;;  %v207_v47 = vadd.f32 %v204_v42, %v100_v46 }
 0x2b4   :  { %229 = vrot.lane.b32.xlu2 %v227_v43, %s836_s9  ;;  %v748_v48 = vmul.f32 -1.442695, %v207_v47 }
 0x2b6   :  { %783 = vpow2.f32 %v748_v48 }
 0x2bc   :  { %v784_v49 = vpop.eup %783 }
 0x2bd   :  { %v211_v50 = vadd.f32 1.0, %v784_v49 }
 0x2bf   :  { %785 = vrcp.f32 %v211_v50  ;;  %v223_v56 = vand.u32 2147483648, %v211_v50  ;;  %vm217_vm6 = vweird.f32 %v211_v50  ;;  %v221_v57 = vand.u32 2147483647, %v211_v50 }
 0x2c1   :  { %v224_v59 = vor.u32 1.1754944e-38, %v223_v56  ;;  %vm222_vm8 = vcmp.eq.f32.partialorder %v221_v57, 8.507059e+37 }
 0x2c5   :  { %v786_v51 = vpop.eup %785 }
 0x2c6   :  { %v213_v52 = vmul.f32 %v786_v51, %v211_v50  ;;  %vm218_vm5 = vweird.f32 %v786_v51 }
 0x2c7   :  { %vm219_vm7 = vmor %vm217_vm6, %vm218_vm5 }
 0x2c8   :  { %v214_v53 = vsub.f32 1.0, %v213_v52 }
 0x2ca   :  { %v215_v54 = vmul.f32 %v786_v51, %v214_v53 }
 0x2cc   :  { %v216_v55 = vadd.f32 %v786_v51, %v215_v54 }
 0x2ce   :  { %v220_v58 = vsel %vm219_vm7, %v786_v51, %v216_v55 }
 0x2cf   :  { %v225_v61 = vsel %vm222_vm8, %v224_v59, %v220_v58 }
 0x2d0   :  { %v239_v3 = vsub.f32 1.0, %v225_v61  ;;  %v245_v5 = vmul.f32 %v225_v61, %v181_v39 }
 0x30e   :  { %v230_v60 = vpop.permute.xlu2 %229 }
 0x30f   :  { %v232_v62 = vmul.f32 %v230_v60, %v225_v61 }
 0x311   :  { %234 = vrot.lane.b32.xlu0 %v232_v62, %s836_s9 }
 0x319   :  { %50 = vperm.xlu0 %769, %v30_v63  }
 0x383   :  { %v235_v0 = vpop.permute.xlu0 %234 }
 0x384   :  { %v237_v1 = vadd.f32 %v235_v0, %v100_v46  ;;  %v32_v0 = vld [vmem:[%s1020_s0 + $0x20] sm:$0xff] }
 0x386   :  { %787 = vtanh.f32 %v237_v1 }
 0x38b   :  { %v51_v14 = vpop.permute.xlu0 %50 }
 0x38c   :  { %v788_v2 = vpop.eup %787  ;;  %v88_v15 = vmul.f32 %v906_v11, %v51_v14 }
 0x38d   :  { %241 = vrot.lane.b32.xlu1 %v788_v2, %s838_s1 }
 0x38e   :  { %v101_v16 = vadd.f32 %v911_v13, %v88_v15 }
 0x3ff   :  { %v242_v4 = vpop.permute.xlu1 %241 }
 0x400   :  { %v244_v6 = vmul.f32 %v242_v4, %v239_v3 }
 0x402   :  { %v246_v7 = vadd.f32 %v245_v5, %v244_v6 }
 0x404   :  { %248 = vrot.lane.b32.xlu2 %v246_v7, %s838_s1 }
 0x45e   :  { %v249_v9 = vpop.permute.xlu2 %248 }
 0x45f   :  { %749 = vmatmul.msk.f32.vlgmr.msra.gmra.mxu2 %vm113_vm4, %v249_v9 }
 0x4e2   :  { %v269_v10 = vpop.f32.mrf.mxu2 }
 0x4e3   :  { %v292_v12 = vadd.f32 %v269_v10, %v899_v8  ;;  %v272_v17 = vadd.f32 %v269_v10, %v101_v16 }
 0x4e5   :  { %294 = vrot.lane.b32.xlu1 %v292_v12, %s836_s9  ;;  %v750_v18 = vmul.f32 -1.442695, %v272_v17 }
 0x4e7   :  { %789 = vpow2.f32 %v750_v18 }
 0x4ed   :  { %v790_v19 = vpop.eup %789 }
 0x4ee   :  { %v276_v20 = vadd.f32 1.0, %v790_v19 }
 0x4f0   :  { %791 = vrcp.f32 %v276_v20  ;;  %v288_v26 = vand.u32 2147483648, %v276_v20  ;;  %vm282_vm10 = vweird.f32 %v276_v20  ;;  %v286_v27 = vand.u32 2147483647, %v276_v20 }
 0x4f2   :  { %v289_v29 = vor.u32 1.1754944e-38, %v288_v26  ;;  %vm287_vm12 = vcmp.eq.f32.partialorder %v286_v27, 8.507059e+37 }
 0x4f6   :  { %v792_v21 = vpop.eup %791 }
 0x4f7   :  { %v278_v22 = vmul.f32 %v792_v21, %v276_v20  ;;  %vm283_vm9 = vweird.f32 %v792_v21 }
 0x4f8   :  { %vm284_vm11 = vmor %vm282_vm10, %vm283_vm9 }
 0x4f9   :  { %v279_v23 = vsub.f32 1.0, %v278_v22 }
 0x4fb   :  { %v280_v24 = vmul.f32 %v792_v21, %v279_v23 }
 0x4fd   :  { %v281_v25 = vadd.f32 %v792_v21, %v280_v24 }
 0x4ff   :  { %v285_v28 = vsel %vm284_vm11, %v792_v21, %v281_v25 }
 0x500   :  { %v290_v31 = vsel %vm287_vm12, %v289_v29, %v285_v28 }
 0x501   :  { %v304_v36 = vsub.f32 1.0, %v290_v31  ;;  %v310_v38 = vmul.f32 %v290_v31, %v246_v7 }
 0x557   :  { %v295_v30 = vpop.permute.xlu1 %294 }
 0x558   :  { %v297_v32 = vmul.f32 %v295_v30, %v290_v31 }
 0x55a   :  { %299 = vrot.lane.b32.xlu2 %v297_v32, %s836_s9 }
 0x562   :  { %55 = vperm.xlu2 %771, %v31_v41  }
 0x5b4   :  { %v300_v33 = vpop.permute.xlu2 %299 }
 0x5b5   :  { %v302_v34 = vadd.f32 %v300_v33, %v101_v16 }
 0x5b7   :  { %793 = vtanh.f32 %v302_v34  ;;  %v33_v34 = vld [vmem:[%s1020_s0 + $0x28] sm:$0xff] }
 0x5bc   :  { %v56_v45 = vpop.permute.xlu2 %55 }
 0x5bd   :  { %v794_v35 = vpop.eup %793  ;;  %v89_v46 = vmul.f32 %v906_v11, %v56_v45 }
 0x5be   :  { %306 = vrot.lane.b32.xlu0 %v794_v35, %s838_s1 }
 0x5bf   :  { %v102_v47 = vadd.f32 %v911_v13, %v89_v46 }
 0x630   :  { %v307_v37 = vpop.permute.xlu0 %306 }
 0x631   :  { %v309_v39 = vmul.f32 %v307_v37, %v304_v36 }
 0x633   :  { %v311_v40 = vadd.f32 %v310_v38, %v309_v39 }
 0x635   :  { %313 = vrot.lane.b32.xlu1 %v311_v40, %s838_s1 }
 0x6a7   :  { %v314_v42 = vpop.permute.xlu1 %313 }
 0x6a8   :  { %751 = vmatmul.msk.f32.vlgmr.msra.gmra.mxu3 %vm113_vm4, %v314_v42 }
 0x72b   :  { %v334_v43 = vpop.f32.mrf.mxu3 }
 0x72c   :  { %v357_v44 = vadd.f32 %v334_v43, %v899_v8  ;;  %v337_v48 = vadd.f32 %v334_v43, %v102_v47 }
 0x72e   :  { %359 = vrot.lane.b32.xlu0 %v357_v44, %s836_s9  ;;  %v752_v49 = vmul.f32 -1.442695, %v337_v48 }
 0x730   :  { %795 = vpow2.f32 %v752_v49 }
 0x736   :  { %v796_v50 = vpop.eup %795 }
 0x737   :  { %v341_v51 = vadd.f32 1.0, %v796_v50 }
 0x739   :  { %797 = vrcp.f32 %v341_v51  ;;  %v353_v57 = vand.u32 2147483648, %v341_v51  ;;  %vm347_vm14 = vweird.f32 %v341_v51  ;;  %v351_v58 = vand.u32 2147483647, %v341_v51 }
 0x73b   :  { %v354_v60 = vor.u32 1.1754944e-38, %v353_v57  ;;  %vm352_vm0 = vcmp.eq.f32.partialorder %v351_v58, 8.507059e+37 }
 0x73f   :  { %v798_v52 = vpop.eup %797 }
 0x740   :  { %v343_v53 = vmul.f32 %v798_v52, %v341_v51  ;;  %vm348_vm13 = vweird.f32 %v798_v52 }
 0x741   :  { %vm349_vm15 = vmor %vm347_vm14, %vm348_vm13 }
 0x742   :  { %v344_v54 = vsub.f32 1.0, %v343_v53 }
 0x744   :  { %v345_v55 = vmul.f32 %v798_v52, %v344_v54 }
 0x746   :  { %v346_v56 = vadd.f32 %v798_v52, %v345_v55 }
 0x748   :  { %v350_v59 = vsel %vm349_vm15, %v798_v52, %v346_v56 }
 0x749   :  { %v355_v62 = vsel %vm352_vm0, %v354_v60, %v350_v59 }
 0x74a   :  { %v369_v4 = vsub.f32 1.0, %v355_v62  ;;  %v375_v6 = vmul.f32 %v355_v62, %v311_v40 }
 0x7a0   :  { %v360_v61 = vpop.permute.xlu0 %359 }
 0x7a1   :  { %v362_v63 = vmul.f32 %v360_v61, %v355_v62 }
 0x7a3   :  { %364 = vrot.lane.b32.xlu1 %v362_v63, %s836_s9 }
 0x7ab   :  { %60 = vperm.xlu1 %770, %v32_v0  }
 0x815   :  { %v365_v1 = vpop.permute.xlu1 %364 }
 0x816   :  { %v367_v2 = vadd.f32 %v365_v1, %v102_v47  ;;  %v34_v1 = vld [vmem:[%s1020_s0 + $0x30] sm:$0xff] }
 0x818   :  { %799 = vtanh.f32 %v367_v2 }
 0x81d   :  { %v61_v15 = vpop.permute.xlu1 %60 }
 0x81e   :  { %v800_v3 = vpop.eup %799  ;;  %v90_v16 = vmul.f32 %v906_v11, %v61_v15 }
 0x81f   :  { %371 = vrot.lane.b32.xlu2 %v800_v3, %s838_s1 }
 0x820   :  { %v103_v17 = vadd.f32 %v911_v13, %v90_v16 }
 0x879   :  { %v372_v5 = vpop.permute.xlu2 %371 }
 0x87a   :  { %v374_v7 = vmul.f32 %v372_v5, %v369_v4 }
 0x87c   :  { %v376_v9 = vadd.f32 %v375_v6, %v374_v7 }
 0x87e   :  { %378 = vrot.lane.b32.xlu0 %v376_v9, %s838_s1 }
 0x8f0   :  { %v379_v10 = vpop.permute.xlu0 %378 }
 0x8f1   :  { %753 = vmatmul.msk.f32.vlgmr.msrb.gmra.mxu0 %vm113_vm4, %v379_v10 }
 0x96e   :  { %v399_v12 = vpop.f32.mrf.mxu0 }
 0x96f   :  { %v422_v14 = vadd.f32 %v399_v12, %v899_v8  ;;  %v402_v18 = vadd.f32 %v399_v12, %v103_v17 }
 0x971   :  { %424 = vrot.lane.b32.xlu2 %v422_v14, %s836_s9  ;;  %v754_v19 = vmul.f32 -1.442695, %v402_v18 }
 0x973   :  { %801 = vpow2.f32 %v754_v19 }
 0x979   :  { %v802_v20 = vpop.eup %801 }
 0x97a   :  { %v406_v21 = vadd.f32 1.0, %v802_v20 }
 0x97c   :  { %803 = vrcp.f32 %v406_v21  ;;  %v418_v27 = vand.u32 2147483648, %v406_v21  ;;  %vm412_vm2 = vweird.f32 %v406_v21  ;;  %v416_v28 = vand.u32 2147483647, %v406_v21 }
 0x97e   :  { %v419_v30 = vor.u32 1.1754944e-38, %v418_v27  ;;  %vm417_vm5 = vcmp.eq.f32.partialorder %v416_v28, 8.507059e+37 }
 0x982   :  { %v804_v22 = vpop.eup %803 }
 0x983   :  { %v408_v23 = vmul.f32 %v804_v22, %v406_v21  ;;  %vm413_vm1 = vweird.f32 %v804_v22 }
 0x984   :  { %vm414_vm3 = vmor %vm412_vm2, %vm413_vm1 }
 0x985   :  { %v409_v24 = vsub.f32 1.0, %v408_v23 }
 0x987   :  { %v410_v25 = vmul.f32 %v804_v22, %v409_v24 }
 0x989   :  { %v411_v26 = vadd.f32 %v804_v22, %v410_v25 }
 0x98b   :  { %v415_v29 = vsel %vm414_vm3, %v804_v22, %v411_v26 }
 0x98c   :  { %v420_v32 = vsel %vm417_vm5, %v419_v30, %v415_v29 }
 0x98d   :  { %v434_v38 = vsub.f32 1.0, %v420_v32  ;;  %v440_v40 = vmul.f32 %v420_v32, %v376_v9 }
 0x9cb   :  { %v425_v31 = vpop.permute.xlu2 %424 }
 0x9cc   :  { %v427_v33 = vmul.f32 %v425_v31, %v420_v32 }
 0x9ce   :  { %429 = vrot.lane.b32.xlu0 %v427_v33, %s836_s9 }
 0x9d6   :  { %65 = vperm.xlu0 %769, %v33_v34  }
 0xa40   :  { %v430_v35 = vpop.permute.xlu0 %429 }
 0xa41   :  { %v432_v36 = vadd.f32 %v430_v35, %v103_v17  ;;  %v35_v35 = vld [vmem:[%s1020_s0 + $0x38] sm:$0xff] }
 0xa43   :  { %805 = vtanh.f32 %v432_v36 }
 0xa48   :  { %v66_v46 = vpop.permute.xlu0 %65 }
 0xa49   :  { %v806_v37 = vpop.eup %805  ;;  %v91_v47 = vmul.f32 %v906_v11, %v66_v46 }
 0xa4a   :  { %436 = vrot.lane.b32.xlu1 %v806_v37, %s838_s1 }
 0xa4b   :  { %v104_v48 = vadd.f32 %v911_v13, %v91_v47 }
 0xabc   :  { %v437_v39 = vpop.permute.xlu1 %436 }
 0xabd   :  { %v439_v41 = vmul.f32 %v437_v39, %v434_v38 }
 0xabf   :  { %v441_v42 = vadd.f32 %v440_v40, %v439_v41 }
 0xac1   :  { %443 = vrot.lane.b32.xlu2 %v441_v42, %s838_s1 }
 0xb1b   :  { %v444_v43 = vpop.permute.xlu2 %443 }
 0xb1c   :  { %755 = vmatmul.msk.f32.vlgmr.msrb.gmra.mxu1 %vm113_vm4, %v444_v43 }
 0xb99   :  { %v464_v44 = vpop.f32.mrf.mxu1 }
 0xb9a   :  { %v487_v45 = vadd.f32 %v464_v44, %v899_v8  ;;  %v467_v49 = vadd.f32 %v464_v44, %v104_v48 }
 0xb9c   :  { %489 = vrot.lane.b32.xlu1 %v487_v45, %s836_s9  ;;  %v756_v50 = vmul.f32 -1.442695, %v467_v49 }
 0xb9e   :  { %807 = vpow2.f32 %v756_v50 }
 0xba4   :  { %v808_v51 = vpop.eup %807 }
 0xba5   :  { %v471_v52 = vadd.f32 1.0, %v808_v51 }
 0xba7   :  { %809 = vrcp.f32 %v471_v52  ;;  %v483_v58 = vand.u32 2147483648, %v471_v52  ;;  %vm477_vm7 = vweird.f32 %v471_v52  ;;  %v481_v59 = vand.u32 2147483647, %v471_v52 }
 0xba9   :  { %v484_v61 = vor.u32 1.1754944e-38, %v483_v58  ;;  %vm482_vm9 = vcmp.eq.f32.partialorder %v481_v59, 8.507059e+37 }
 0xbad   :  { %v810_v53 = vpop.eup %809 }
 0xbae   :  { %v473_v54 = vmul.f32 %v810_v53, %v471_v52  ;;  %vm478_vm6 = vweird.f32 %v810_v53 }
 0xbaf   :  { %vm479_vm8 = vmor %vm477_vm7, %vm478_vm6 }
 0xbb0   :  { %v474_v55 = vsub.f32 1.0, %v473_v54 }
 0xbb2   :  { %v475_v56 = vmul.f32 %v810_v53, %v474_v55 }
 0xbb4   :  { %v476_v57 = vadd.f32 %v810_v53, %v475_v56 }
 0xbb6   :  { %v480_v60 = vsel %vm479_vm8, %v810_v53, %v476_v57 }
 0xbb7   :  { %v485_v63 = vsel %vm482_vm9, %v484_v61, %v480_v60  ;;  %vm740_vm9 = vcmask 7168  }
 0xbb8   :  { %v499_v5 = vsub.f32 1.0, %v485_v63  ;;  %v505_v7 = vmul.f32 %v485_v63, %v441_v42 }
 0xc0e   :  { %v490_v62 = vpop.permute.xlu1 %489 }
 0xc0f   :  { %v492_v0 = vmul.f32 %v490_v62, %v485_v63 }
 0xc11   :  { %494 = vrot.lane.b32.xlu2 %v492_v0, %s836_s9 }
 0xc19   :  { %70 = vperm.xlu2 %771, %v34_v1  }
 0xc6b   :  { %v495_v2 = vpop.permute.xlu2 %494 }
 0xc6c   :  { %v497_v3 = vadd.f32 %v495_v2, %v104_v48  ;;  %v36_v2 = vld [vmem:[%s1020_s0 + $0x40] sm:$0xff] }
 0xc6e   :  { %811 = vtanh.f32 %v497_v3 }
 0xc73   :  { %v71_v16 = vpop.permute.xlu2 %70 }
 0xc74   :  { %v812_v4 = vpop.eup %811  ;;  %v92_v17 = vmul.f32 %v906_v11, %v71_v16 }
 0xc75   :  { %501 = vrot.lane.b32.xlu0 %v812_v4, %s838_s1 }
 0xc76   :  { %v105_v18 = vadd.f32 %v911_v13, %v92_v17 }
 0xce7   :  { %v502_v6 = vpop.permute.xlu0 %501 }
 0xce8   :  { %v504_v9 = vmul.f32 %v502_v6, %v499_v5 }
 0xcea   :  { %v506_v10 = vadd.f32 %v505_v7, %v504_v9 }
 0xcec   :  { %508 = vrot.lane.b32.xlu1 %v506_v10, %s838_s1 }
 0xd5e   :  { %v509_v12 = vpop.permute.xlu1 %508 }
 0xd5f   :  { %757 = vmatmul.msk.f32.vlgmr.msrb.gmra.mxu2 %vm113_vm4, %v509_v12 }
 0xde2   :  { %v529_v14 = vpop.f32.mrf.mxu2 }
 0xde3   :  { %v552_v15 = vadd.f32 %v529_v14, %v899_v8  ;;  %v532_v19 = vadd.f32 %v529_v14, %v105_v18 }
 0xde5   :  { %554 = vrot.lane.b32.xlu0 %v552_v15, %s836_s9  ;;  %v758_v20 = vmul.f32 -1.442695, %v532_v19 }
 0xde7   :  { %813 = vpow2.f32 %v758_v20 }
 0xded   :  { %v814_v21 = vpop.eup %813 }
 0xdee   :  { %v536_v22 = vadd.f32 1.0, %v814_v21 }
 0xdf0   :  { %815 = vrcp.f32 %v536_v22  ;;  %v548_v28 = vand.u32 2147483648, %v536_v22  ;;  %vm542_vm11 = vweird.f32 %v536_v22  ;;  %v546_v29 = vand.u32 2147483647, %v536_v22 }
 0xdf2   :  { %v549_v31 = vor.u32 1.1754944e-38, %v548_v28  ;;  %vm547_vm13 = vcmp.eq.f32.partialorder %v546_v29, 8.507059e+37 }
 0xdf6   :  { %v816_v23 = vpop.eup %815 }
 0xdf7   :  { %v538_v24 = vmul.f32 %v816_v23, %v536_v22  ;;  %vm543_vm10 = vweird.f32 %v816_v23 }
 0xdf8   :  { %vm544_vm12 = vmor %vm542_vm11, %vm543_vm10 }
 0xdf9   :  { %v539_v25 = vsub.f32 1.0, %v538_v24 }
 0xdfb   :  { %v540_v26 = vmul.f32 %v816_v23, %v539_v25 }
 0xdfd   :  { %v541_v27 = vadd.f32 %v816_v23, %v540_v26 }
 0xdff   :  { %v545_v30 = vsel %vm544_vm12, %v816_v23, %v541_v27 }
 0xe00   :  { %v550_v33 = vsel %vm547_vm13, %v549_v31, %v545_v30 }
 0xe01   :  { %v564_v39 = vsub.f32 1.0, %v550_v33  ;;  %v570_v41 = vmul.f32 %v550_v33, %v506_v10 }
 0xe57   :  { %v555_v32 = vpop.permute.xlu0 %554 }
 0xe58   :  { %v557_v34 = vmul.f32 %v555_v32, %v550_v33  ;;  %v775_v33 = vld [vmem:[%s1021_s5] ss:$0 sm:$0xff] }
 0xe5a   :  { %559 = vrot.lane.b32.xlu1 %v557_v34, %s836_s9 }
 0xe62   :  { %75 = vperm.xlu1 %770, %v35_v35  }
 0xecc   :  { %v560_v36 = vpop.permute.xlu1 %559 }
 0xecd   :  { %v562_v37 = vadd.f32 %v560_v36, %v105_v18 }
 0xecf   :  { %817 = vtanh.f32 %v562_v37 }
 0xed4   :  { %v76_v47 = vpop.permute.xlu1 %75 }
 0xed5   :  { %v818_v38 = vpop.eup %817  ;;  %v93_v48 = vmul.f32 %v906_v11, %v76_v47 }
 0xed6   :  { %566 = vrot.lane.b32.xlu2 %v818_v38, %s838_s1 }
 0xed7   :  { %v106_v49 = vadd.f32 %v911_v13, %v93_v48 }
 0xf30   :  { %v567_v40 = vpop.permute.xlu2 %566 }
 0xf31   :  { %v569_v42 = vmul.f32 %v567_v40, %v564_v39 }
 0xf33   :  { %v571_v43 = vadd.f32 %v570_v41, %v569_v42 }
 0xf35   :  { %573 = vrot.lane.b32.xlu0 %v571_v43, %s838_s1 }
 0xfa7   :  { %v574_v44 = vpop.permute.xlu0 %573 }
 0xfa8   :  { %759 = vmatmul.msk.f32.vlgmr.msrb.gmra.mxu3 %vm113_vm4, %v574_v44  ;;  %v12_v44 = vstv %s1022_s6 }
 0xfa9   :  { %13 = vst [vmem:[#allocation2] sm:$0x1] %v12_v44 }
 0xfb0   :  { %v776_v47 = vld [vmem:[#allocation2] ss:$0 sm:$0xff] }
0x102b   :  { %v594_v45 = vpop.f32.mrf.mxu3 }
0x102c   :  { %v617_v46 = vadd.f32 %v594_v45, %v899_v8  ;;  %v597_v50 = vadd.f32 %v594_v45, %v106_v49 }
0x102e   :  { %619 = vrot.lane.b32.xlu2 %v617_v46, %s836_s9  ;;  %v760_v51 = vmul.f32 -1.442695, %v597_v50 }
0x1030   :  { %819 = vpow2.f32 %v760_v51 }
0x1036   :  { %v820_v52 = vpop.eup %819 }
0x1037   :  { %v601_v53 = vadd.f32 1.0, %v820_v52 }
0x1039   :  { %821 = vrcp.f32 %v601_v53  ;;  %v613_v59 = vand.u32 2147483648, %v601_v53  ;;  %vm607_vm15 = vweird.f32 %v601_v53  ;;  %v611_v60 = vand.u32 2147483647, %v601_v53 }
0x103b   :  { %v614_v62 = vor.u32 1.1754944e-38, %v613_v59  ;;  %vm612_vm1 = vcmp.eq.f32.partialorder %v611_v60, 8.507059e+37 }
0x103f   :  { %v822_v54 = vpop.eup %821 }
0x1040   :  { %v603_v55 = vmul.f32 %v822_v54, %v601_v53  ;;  %vm608_vm14 = vweird.f32 %v822_v54 }
0x1041   :  { %vm609_vm0 = vmor %vm607_vm15, %vm608_vm14 }
0x1042   :  { %v604_v56 = vsub.f32 1.0, %v603_v55 }
0x1044   :  { %v605_v57 = vmul.f32 %v822_v54, %v604_v56 }
0x1046   :  { %v606_v58 = vadd.f32 %v822_v54, %v605_v57 }
0x1048   :  { %v610_v61 = vsel %vm609_vm0, %v822_v54, %v606_v58 }
0x1049   :  { %v615_v0 = vsel %vm612_vm1, %v614_v62, %v610_v61 }
0x104a   :  { %v629_v6 = vsub.f32 1.0, %v615_v0  ;;  %v635_v9 = vmul.f32 %v615_v0, %v571_v43 }
0x1088   :  { %v620_v63 = vpop.permute.xlu2 %619 }
0x1089   :  { %v622_v1 = vmul.f32 %v620_v63, %v615_v0 }
0x108b   :  { %624 = vrot.lane.b32.xlu0 %v622_v1, %s836_s9 }
0x1093   :  { %80 = vperm.xlu0 %769, %v36_v2  }
0x10fd   :  { %v625_v3 = vpop.permute.xlu0 %624 }
0x10fe   :  { %v627_v4 = vadd.f32 %v625_v3, %v106_v49 }
0x1100   :  { %823 = vtanh.f32 %v627_v4 }
0x1105   :  { %v81_v17 = vpop.permute.xlu0 %80 }
0x1106   :  { %v824_v5 = vpop.eup %823  ;;  %v94_v18 = vmul.f32 %v906_v11, %v81_v17 }
0x1107   :  { %631 = vrot.lane.b32.xlu1 %v824_v5, %s838_s1 }
0x1108   :  { %v107_v19 = vadd.f32 %v911_v13, %v94_v18 }
0x1179   :  { %v632_v7 = vpop.permute.xlu1 %631 }
0x117a   :  { %v634_v10 = vmul.f32 %v632_v7, %v629_v6 }
0x117c   :  { %v636_v12 = vadd.f32 %v635_v9, %v634_v10 }
0x117e   :  { %638 = vrot.lane.b32.xlu2 %v636_v12, %s838_s1 }
0x11d8   :  { %v639_v14 = vpop.permute.xlu2 %638 }
0x11d9   :  { %761 = vmatmul.msk.f32.vlgmr.msra.gmra.mxu0 %vm113_vm4, %v639_v14 }
0x1256   :  { %v659_v15 = vpop.f32.mrf.mxu0 }
0x1257   :  { %v682_v16 = vadd.f32 %v659_v15, %v899_v8  ;;  %v662_v20 = vadd.f32 %v659_v15, %v107_v19 }
0x1259   :  { %684 = vrot.lane.b32.xlu1 %v682_v16, %s836_s9  ;;  %v762_v21 = vmul.f32 -1.442695, %v662_v20 }
0x125b   :  { %825 = vpow2.f32 %v762_v21 }
0x1261   :  { %v826_v22 = vpop.eup %825  ;;  %705 = vrot.lane.b32.xlu1 %v775_v33, %s839_s10 }
0x1262   :  { %v666_v23 = vadd.f32 1.0, %v826_v22 }
0x1264   :  { %827 = vrcp.f32 %v666_v23  ;;  %v678_v8 = vand.u32 2147483648, %v666_v23  ;;  %vm672_vm3 = vweird.f32 %v666_v23  ;;  %v676_v29 = vand.u32 2147483647, %v666_v23 }
0x1266   :  { %v679_v11 = vor.u32 1.1754944e-38, %v678_v8  ;;  %vm677_vm6 = vcmp.eq.f32.partialorder %v676_v29, 8.507059e+37 }
0x126a   :  { %v828_v24 = vpop.eup %827 }
0x126b   :  { %v668_v25 = vmul.f32 %v828_v24, %v666_v23  ;;  %vm673_vm2 = vweird.f32 %v828_v24 }
0x126c   :  { %vm674_vm5 = vmor %vm672_vm3, %vm673_vm2 }
0x126d   :  { %v669_v26 = vsub.f32 1.0, %v668_v25 }
0x126f   :  { %v670_v27 = vmul.f32 %v828_v24, %v669_v26 }
0x1271   :  { %v671_v28 = vadd.f32 %v828_v24, %v670_v27 }
0x1273   :  { %v675_v30 = vsel %vm674_vm5, %v828_v24, %v671_v28 }
0x1274   :  { %v680_v31 = vsel %vm677_vm6, %v679_v11, %v675_v30 }
0x1275   :  { %v694_v37 = vsub.f32 1.0, %v680_v31  ;;  %v700_v40 = vmul.f32 %v680_v31, %v636_v12 }
0x12cb   :  { %v685_v13 = vpop.permute.xlu1 %684 }
0x12cc   :  { %v687_v32 = vmul.f32 %v685_v13, %v680_v31 }
0x12ce   :  { %689 = vrot.lane.b32.xlu2 %v687_v32, %s836_s9 }
0x12d3   :  { %v706_v41 = vpop.permute.xlu1 %705 }
0x1328   :  { %v690_v34 = vpop.permute.xlu2 %689 }
0x1329   :  { %v692_v35 = vadd.f32 %v690_v34, %v107_v19 }
0x132b   :  { %829 = vtanh.f32 %v692_v35 }
0x1331   :  { %v830_v36 = vpop.eup %829 }
0x1332   :  { %696 = vrot.lane.b32.xlu0 %v830_v36, %s838_s1 }
0x13a4   :  { %v697_v38 = vpop.permute.xlu0 %696 }
0x13a5   :  { %v699_v39 = vmul.f32 %v697_v38, %v694_v37 }
0x13a7   :  { %v701_v42 = vadd.f32 %v700_v40, %v699_v39 }
0x13a9   :  { %v708_v43 = vmul.f32 %v706_v41, %v701_v42 }
0x13ab   :  { %710 = vrot.lane.b32.xlu2 %v708_v43, %s838_s1 }
0x1405   :  { %v711_v45 = vpop.permute.xlu2 %710 }
0x1406   :  { %v713_v46 = vsel %vm113_vm4, %v711_v45, 0.0 }
0x1407   :  { %714 = vadd.xlane.f32.xlu0 %v713_v46 }
0x147a   :  { %v715_v48 = vpop.xlane.xlu0 %714 }
0x147b   :  { %v720_v49 = vadd.f32 %v776_v47, %v715_v48 }
0x147d   :  { %v763_v50 = vmul.f32 -1.442695, %v720_v49 }
0x147f   :  { %831 = vpow2.f32 %v763_v50 }
0x1485   :  { %v832_v51 = vpop.eup %831 }
0x1486   :  { %v724_v52 = vadd.f32 1.0, %v832_v51 }
0x1488   :  { %833 = vrcp.f32 %v724_v52  ;;  %v736_v56 = vand.u32 2147483648, %v724_v52  ;;  %v734_v58 = vand.u32 2147483647, %v724_v52  ;;  %vm730_vm8 = vweird.f32 %v724_v52 }
0x148a   :  { %v737_v60 = vor.u32 1.1754944e-38, %v736_v56  ;;  %vm735_vm10 = vcmp.eq.f32.partialorder %v734_v58, 8.507059e+37 }
0x148e   :  { %v834_v53 = vpop.eup %833 }
0x148f   :  { %v726_v54 = vmul.f32 %v834_v53, %v724_v52  ;;  %vm731_vm7 = vweird.f32 %v834_v53 }
0x1490   :  { %vm732_vm4 = vmor %vm730_vm8, %vm731_vm7 }
0x1491   :  { %v727_v55 = vsub.f32 1.0, %v726_v54 }
0x1493   :  { %v728_v57 = vmul.f32 %v834_v53, %v727_v55 }
0x1495   :  { %v729_v59 = vadd.f32 %v834_v53, %v728_v57 }
0x1497   :  { %v733_v61 = vsel %vm732_vm4, %v834_v53, %v729_v59 }
0x1498   :  { %v738_v62 = vsel %vm735_vm10, %v737_v60, %v733_v61 }
0x1499   :  { %741 = vst.msk [vmem:[%s1023_s7] sm:$0xff] %vm740_vm9, %v738_v62 }

</bundles_post_ra>
